<compile_context>
chip_gen: v7x
topology: tpu7x:2x2x1
jax: 0.10.0
libtpu: 0.0.40
codegen_flags: <defaults>
</compile_context>

<pallas_src>
import functools

import jax
import jax.numpy as jnp
from jax.experimental import pallas as pl
from jax.experimental.pallas import tpu as pltpu


def _sa_loss_kernel(x_ref, o_ref, *, inv_hw, batch, tile_b):
    """x_ref: (TB, 3, S, L) or (TB, 3, HW) block in the input's HBM dtype."""
    ndim = len(x_ref.shape)
    acc = None
    for ch in range(3):                                    # static unroll (r, g, b)
        if ndim == 4:
            xc = x_ref[:, ch, :, :].astype(jnp.float32)    # (TB, S, L)
        else:
            xc = x_ref[:, ch, :].astype(jnp.float32)       # (TB, HW)
        spatial_axes = tuple(range(1, xc.ndim))
        mean_c = jnp.sum(xc, axis=spatial_axes, keepdims=True) * inv_hw
        d = xc - mean_c
        acc = d * d if acc is None else acc + d * d
    k = jnp.sqrt(acc)                                      # per-pixel channel norm

    if batch % tile_b != 0:
        # Tail block of the cdiv grid: images past the true batch size hold
        # unspecified data; zero their contribution (where() blocks NaN/Inf).
        valid = batch - pl.program_id(0) * tile_b
        img_idx = jax.lax.broadcasted_iota(
            jnp.int32, (tile_b,) + (1,) * (k.ndim - 1), 0)
        k = jnp.where(img_idx < valid, k, 0.0)

    # Lane-axis reduce first, then the rest (keeps the f32 sum well-conditioned
    # for large blocks); one partial sum per grid step.
    total = jnp.sum(jnp.sum(k, axis=-1, keepdims=True))
    o_ref[...] = jnp.reshape(total, (1, 1, 1))


def _round_up(x, m):
    return (x + m - 1) // m * m


def _vmem_capacity_bytes():
    try:
        info = pltpu.get_tpu_info()
        cap = getattr(info, "vmem_capacity_bytes", None)
        if cap:
            return int(cap)
    except Exception:
        pass
    return 64 * 1024 * 1024  # conservative default (v7x per-TensorCore VMEM)


def _choose_spatial_split(hw, in_sublane):
    """Split hw = S * L (L a multiple of 128) minimising the padded footprint.

    Returns (S, L), or None if the flat (3, hw) layout is at least as compact
    (e.g. hw % 128 != 0, or tiny images where padding S->8/16 dominates).
    """
    if hw % 128 != 0:
        return None
    best = None  # (padded_elems_per_image, -L, S, L)
    L = 128
    while L <= hw:
        if hw % L == 0:
            S = hw // L
            cand = (3 * _round_up(S, in_sublane) * L, -L, S, L)
            if best is None or cand < best:
                best = cand
        L += 128
    flat_padded = _round_up(3, in_sublane) * _round_up(hw, 128)
    if best is None or best[0] > flat_padded:
        return None
    return best[2], best[3]


def _plan_tiles(b, hw, split, itemsize, in_sublane):
    """Pick images-per-block (TB), grid size, and vmem_limit_bytes."""
    vmem_cap = _vmem_capacity_bytes()
    # Working budget for one grid step (double-buffered input + f32 planes):
    # ~60% of physical VMEM, capped so v5e/v6e (128 MiB) keep headroom.
    budget = min(int(vmem_cap * 0.6), 56 * 1024 * 1024)

    if split is None:
        in_elems = _round_up(3, in_sublane) * _round_up(hw, 128)   # padded input / image
        f32_elems = _round_up(hw, 128)                              # padded f32 plane / image
    else:
        s_dim, l_dim = split
        in_elems = 3 * _round_up(s_dim, in_sublane) * l_dim
        f32_elems = _round_up(s_dim, 8) * l_dim

    # Double-buffered native-dtype input + ~4 live f32 planes (conservative).
    per_img = 2 * in_elems * itemsize + 4 * f32_elems * 4
    assert per_img <= budget, (
        f"Sa_Loss kernel: a single image needs ~{per_img / 2**20:.1f} MiB of "
        f"VMEM (padded, double-buffered) but the budget is "
        f"{budget / 2**20:.1f} MiB; a spatially-tiled two-pass variant is "
        "required for images this large.")
    # TODO(synk): spatially-tiled two-pass variant (channel-mean pass + recompute
    # pass) for images whose full spatial extent does not fit in VMEM.

    tb = max(1, budget // per_img)
    tb = min(tb, b)
    if b >= 2:
        tb = min(tb, -(-b // 2))   # keep >= 2 grid steps so both v7x TCs are fed
    nb = -(-b // tb)

    used = tb * per_img + (1 << 20)
    vmem_limit = min(vmem_cap - (4 << 20),
                     max(32 * 1024 * 1024, used + (24 << 20)))
    return tb, nb, vmem_limit


def sa_loss(x):
    """x: (B, 3, H, W) array -> scalar float32 (matches Sa_Loss.forward)."""
    b, c, h, w = x.shape
    assert c == 3, "Sa_Loss expects a 3-channel (RGB) input"
    hw = h * w

    itemsize = jnp.dtype(x.dtype).itemsize
    in_sublane = max(8, 32 // itemsize)       # 8 for f32, 16 for bf16, 32 for int8
    split = _choose_spatial_split(hw, in_sublane)
    tb, nb, vmem_limit = _plan_tiles(b, hw, split, itemsize, in_sublane)

    if split is None:
        # Lane-dense fallback: last two block dims equal the full (3, HW) dims.
        x2 = x.reshape(b, c, hw)
        block = (tb, c, hw)
        index_map = lambda i: (i, 0, 0)
    else:
        s_dim, l_dim = split
        # Free NCHW reshape; channel stays off the sublane/lane tile.
        x2 = x.reshape(b, c, s_dim, l_dim)
        block = (tb, c, s_dim, l_dim)
        index_map = lambda i: (i, 0, 0, 0)

    kernel = functools.partial(
        _sa_loss_kernel, inv_hw=1.0 / float(hw), batch=b, tile_b=tb)

    partials = pl.pallas_call(
        kernel,
        out_shape=jax.ShapeDtypeStruct((nb, 1, 1), jnp.float32),
        grid_spec=pltpu.PrefetchScalarGridSpec(
            num_scalar_prefetch=0,
            grid=(nb,),
            in_specs=[pl.BlockSpec(block, index_map)],
            out_specs=pl.BlockSpec((1, 1, 1), lambda i: (i, 0, 0)),
        ),
        compiler_params=pltpu.CompilerParams(
            # Independent grid steps: shard across TensorCores on v7x; neutral
            # (sequential loop) on single-TC v5e/v6e.
            dimension_semantics=("parallel",),
            vmem_limit_bytes=vmem_limit,
        ),
    )(x2)

    return jnp.sum(partials) / jnp.float32(b * hw)


def sa_loss_ref(x):
    """Pure-JAX reference mirroring the PyTorch forward exactly."""
    x = x.astype(jnp.float32)
    mean_rgb = jnp.mean(x, axis=(2, 3), keepdims=True)    # (B, 3, 1, 1)
    d = x - mean_rgb                                       # (B, 3, H, W)
    k = jnp.sqrt(jnp.sum(d * d, axis=1))                   # (B, H, W)
    return jnp.mean(k)


if __name__ == "__main__":
    key = jax.random.PRNGKey(0)
    k1, k2, k3 = jax.random.split(key, 3)

    cases = [
        # (B, 3, 32, 32) f32: H*W = 1024 -> (S, L) = (8, 128) split path.
        jax.random.uniform(k1, (2, 3, 32, 32), dtype=jnp.float32),
        # (B=3, 3, 16, 16) f32: flat (3, HW) fallback + odd batch (tail mask).
        jax.random.uniform(k2, (3, 3, 16, 16), dtype=jnp.float32),
        # bf16 streaming path (no wrapper cast; in-kernel per-plane f32 cast).
        jax.random.uniform(k3, (2, 3, 32, 32), dtype=jnp.float32).astype(jnp.bfloat16),
    ]

    for x in cases:
        out = jax.block_until_ready(sa_loss(x))
        ref = jax.block_until_ready(sa_loss_ref(x))
        assert jnp.allclose(out, ref, rtol=1e-4, atol=1e-5), (x.shape, x.dtype, out, ref)

    print("KERNEL_OK")
</pallas_src>

<mosaic_0001>
module attributes {stable_mosaic.version = 11 : i64} {
  func.func @_sa_loss_kernel(%arg0: i32, %arg1: memref<1x3x8x128xf32, #tpu.memory_space<vmem>>, %arg2: memref<1x1x1xf32, #tpu.memory_space<vmem>>) attributes {dimension_semantics = [#tpu.dimension_semantics<parallel>], iteration_bounds = array<i64: 2>, scalar_prefetch = 0 : i64, scratch_operands = 0 : i64, tpu.core_type = #tpu.core_type<tc>, window_params = [{transform_indices = @transform_0, window_bounds = array<i64: 1, 3, 8, 128>}, {transform_indices = @transform_1, window_bounds = array<i64: 1, 1, 1>}]} {
    %c0 = arith.constant 0 : index
    %c0_0 = arith.constant 0 : index
    %c0_1 = arith.constant 0 : index
    %c0_2 = arith.constant 0 : index
    %0 = vector.load %arg1[%c0, %c0_0, %c0_1, %c0_2] : memref<1x3x8x128xf32, #tpu.memory_space<vmem>>, vector<1x1x8x128xf32>
    %1 = vector.shape_cast %0 : vector<1x1x8x128xf32> to vector<1x8x128xf32>
    %cst = arith.constant dense<0.000000e+00> : vector<1xf32>
    %2 = vector.multi_reduction <add>, %1, %cst [1, 2] : vector<1x8x128xf32> to vector<1xf32>
    %3 = vector.shape_cast %2 : vector<1xf32> to vector<1x1x1xf32>
    %cst_3 = arith.constant 9.765625E-4 : f32
    %4 = vector.broadcast %cst_3 : f32 to vector<1x1x1xf32>
    %5 = arith.mulf %3, %4 : vector<1x1x1xf32>
    %6 = vector.broadcast %5 : vector<1x1x1xf32> to vector<1x8x128xf32>
    %7 = arith.subf %1, %6 : vector<1x8x128xf32>
    %8 = arith.mulf %7, %7 : vector<1x8x128xf32>
    %c0_4 = arith.constant 0 : index
    %c1 = arith.constant 1 : index
    %c0_5 = arith.constant 0 : index
    %c0_6 = arith.constant 0 : index
    %9 = vector.load %arg1[%c0_4, %c1, %c0_5, %c0_6] : memref<1x3x8x128xf32, #tpu.memory_space<vmem>>, vector<1x1x8x128xf32>
    %10 = vector.shape_cast %9 : vector<1x1x8x128xf32> to vector<1x8x128xf32>
    %cst_7 = arith.constant dense<0.000000e+00> : vector<1xf32>
    %11 = vector.multi_reduction <add>, %10, %cst_7 [1, 2] : vector<1x8x128xf32> to vector<1xf32>
    %12 = vector.shape_cast %11 : vector<1xf32> to vector<1x1x1xf32>
    %cst_8 = arith.constant 9.765625E-4 : f32
    %13 = vector.broadcast %cst_8 : f32 to vector<1x1x1xf32>
    %14 = arith.mulf %12, %13 : vector<1x1x1xf32>
    %15 = vector.broadcast %14 : vector<1x1x1xf32> to vector<1x8x128xf32>
    %16 = arith.subf %10, %15 : vector<1x8x128xf32>
    %17 = arith.mulf %16, %16 : vector<1x8x128xf32>
    %18 = arith.addf %8, %17 : vector<1x8x128xf32>
    %c0_9 = arith.constant 0 : index
    %c2 = arith.constant 2 : index
    %c0_10 = arith.constant 0 : index
    %c0_11 = arith.constant 0 : index
    %19 = vector.load %arg1[%c0_9, %c2, %c0_10, %c0_11] : memref<1x3x8x128xf32, #tpu.memory_space<vmem>>, vector<1x1x8x128xf32>
    %20 = vector.shape_cast %19 : vector<1x1x8x128xf32> to vector<1x8x128xf32>
    %cst_12 = arith.constant dense<0.000000e+00> : vector<1xf32>
    %21 = vector.multi_reduction <add>, %20, %cst_12 [1, 2] : vector<1x8x128xf32> to vector<1xf32>
    %22 = vector.shape_cast %21 : vector<1xf32> to vector<1x1x1xf32>
    %cst_13 = arith.constant 9.765625E-4 : f32
    %23 = vector.broadcast %cst_13 : f32 to vector<1x1x1xf32>
    %24 = arith.mulf %22, %23 : vector<1x1x1xf32>
    %25 = vector.broadcast %24 : vector<1x1x1xf32> to vector<1x8x128xf32>
    %26 = arith.subf %20, %25 : vector<1x8x128xf32>
    %27 = arith.mulf %26, %26 : vector<1x8x128xf32>
    %28 = arith.addf %18, %27 : vector<1x8x128xf32>
    %29 = math.sqrt %28 : vector<1x8x128xf32>
    %cst_14 = arith.constant dense<0.000000e+00> : vector<1x8xf32>
    %30 = vector.multi_reduction <add>, %29, %cst_14 [2] : vector<1x8x128xf32> to vector<1x8xf32>
    %31 = vector.shape_cast %30 : vector<1x8xf32> to vector<1x8x1xf32>
    %32 = vector.shape_cast %31 : vector<1x8x1xf32> to vector<1x1x8x1xf32>
    %cst_15 = arith.constant dense<0.000000e+00> : vector<1xf32>
    %33 = vector.multi_reduction <add>, %32, %cst_15 [1, 2, 3] : vector<1x1x8x1xf32> to vector<1xf32>
    %34 = vector.shape_cast %33 : vector<1xf32> to vector<1x1x1x1xf32>
    %35 = vector.extract %34[0, 0, 0, 0] : f32 from vector<1x1x1x1xf32>
    %36 = vector.broadcast %35 : f32 to vector<1x1x1xf32>
    %c0_16 = arith.constant 0 : index
    %c0_17 = arith.constant 0 : index
    %c0_18 = arith.constant 0 : index
    %37 = vector.load %arg2[%c0_16, %c0_17, %c0_18] : memref<1x1x1xf32, #tpu.memory_space<vmem>>, vector<1x1x1xf32>
    tpu.vector_store %arg2[%c0_16, %c0_17, %c0_18], %36 {strides = array<i32>} : memref<1x1x1xf32, #tpu.memory_space<vmem>>, vector<1x1x1xf32>,
    return
  }
  func.func @transform_0(%arg0: i32) -> (i32, i32, i32, i32) {
    %c0_i32 = arith.constant 0 : i32
    %c0_i32_0 = arith.constant 0 : i32
    %c0_i32_1 = arith.constant 0 : i32
    %c0_i32_2 = arith.constant 0 : i32
    return %arg0, %c0_i32, %c0_i32_0, %c0_i32_1 : i32, i32, i32, i32
  }
  func.func @transform_1(%arg0: i32) -> (i32, i32, i32) {
    %c0_i32 = arith.constant 0 : i32
    %c0_i32_0 = arith.constant 0 : i32
    %c0_i32_1 = arith.constant 0 : i32
    return %arg0, %c0_i32, %c0_i32_0 : i32, i32, i32
  }
}

</mosaic_0001>

<bundles_post_ra>
// kernel: tpu_custom_call.1
= control target key start
LH: loop header
LB: loop body
LE: loop exit
PB: predicated region body
PF: predicated region fallthrough
CT: control target
= control target key end

     0   :  { %6 = vsyncpa [#allocation3], 0  ;;  %s499_s0 = inlined_call_operand.hbm [shape: f32[2,3,8,128], index: 0, kind: input, shape index: {}]   ;;  %s500_s1 = inlined_call_operand.vmem [shape: f32[2,1,1], index: 1, kind: output, shape index: {}]  }
   0x1   :  { %8 = vsyncpa [#allocation3 + $0x1], 0  ;;  %s391_s6 = smov 0   ;;  %s393_s7 = smov 0  }
   0x2   :  { %s395_s8 = smov 0   ;;  %s397_s9 = smov 0  }
   0x3 LB: > { %s410_s10 = sadd.s32 4294967295, %s376_s9   ;;  %s413_s11 = sadd.s32 1, %s376_s9   ;;  %s376_s9 = sphi %s397_s9, %s507_s9   ;;  %s372_s8 = sphi %s395_s8, %s506_s8   ;;  %s368_s7 = sphi %s393_s7, %s505_s7   ;;  %s364_s6 = sphi %s391_s6, %s504_s6  }
   0x4   : > { %s18_s12 = ssub.s32 %s376_s9, %s413_s11  ;;  %s21_s13 = sadd.s32 1, %s372_s8 }
   0x5   : > { %p19_p0 = scmp.eq.s32.totalorder %s18_s12, 0  ;;  %p28_p1 = scmp.ne.s32.totalorder %s372_s8, %s368_s7 }
   0x6   : > { %p29_p2 = scmp.eq.s32.totalorder %s376_s9, 0  ;;  %p34_p3 = scmp.ne.s32.totalorder %s368_s7, %s364_s6 }
   0x7   : > { %s423_s14 = scalar_select %p19_p0, %s372_s8, %s21_s13  }
   0x8   : > { %p30_p4 = por %p29_p2, %p28_p1  ;;  %p35_p5 = scmp.eq.s32.totalorder %s410_s10, 0 }
   0x9   : > { %p275_p6 = scmp.lt.s32.totalorder %s376_s9, 2  ;;  %s84_s16 = sand.u32 1, %s372_s8  }
   0xa   : > { %p427_p7 = por %p35_p5, %p34_p3  ;;  %s264_s17 = smul.u32 24, %s84_s16 }
   0xb   : > { %s265_s18 = smul.u32 384, %s376_s9  ;;  %p433_p8 = pnand %p275_p6, %p30_p4 }
   0xc   : > { %s88_s23 = scalar_lea.vmem [#allocation2], %s264_s17  ;;  %s445_s25 = scalar_lea.sflag [#allocation3], %s84_s16 }
   0xd   : > { %s440_s22 = scalar_lea.hbm %s499_s0, %s265_s18  ;;  %s95_s24 = sshll.u32 %s88_s23, 4  ;;  %s442_s24 = int_to_ptr.vmem [resolvable:$true] %s95_s24 }
   0xe   : > { %s312_s26 = scalar_lea.hbm %s440_s22, 384  ;;  %p314_p11 = pneg %p433_p8 }
   0xf   : > { %p313_p10 = scmp.ne.s32.totalorder %s440_s22, %s312_s26  ;;  %s317_s29 = scalar_lea.hbm %s499_s0, 768 }
  0x10   : > { %p318_p0 = scmp.lt.u32.totalorder %s440_s22, %s499_s0  ;;  %p319_p1 = scmp.lt.u32.totalorder %s317_s29, %s312_s26 }
  0x11   : > { %p315_p12 = pnand %p314_p11, %p313_p10  ;;  %p321_p3 = scmp.lt.u32.totalorder %s312_s26, %s440_s22 }
  0x12   : > { %p320_p2 = por %p319_p1, %p318_p0 }
  0x13   : > { %p316_p13 = pneg %p315_p12 }
  0x14   : > { %p322_p4 = por %p321_p3, %p320_p2 }
  0x16   : > { %p323_p5 = pnand %p322_p4, %p316_p13 }
  0x18   : > { %326 = shalt.err (!%p323_p5)
}
  0x19   : > { %s327_s3 = scalar_lea.vmem %s442_s24, 384  ;;  %s378_s4 = smov [#allocation2]  }
  0x1a   : > { %p328_p6 = scmp.ne.s32.totalorder %s442_s24, %s327_s3  ;;  %s332_s5 = sshll.u32 %s378_s4, 4  ;;  %s333_s5 = int_to_ptr.vmem [resolvable:$false] %s332_s5 }
  0x1b   : > { %s334_s6 = scalar_lea.vmem %s333_s5, 768  ;;  %p335_p9 = scmp.lt.s32.totalorder %s442_s24, %s333_s5 }
  0x1c   : > { %p330_p10 = pnand %p328_p6, %p314_p11  ;;  %p336_p0 = scmp.lt.s32.totalorder %s334_s6, %s327_s3 }
  0x1e   : > { %p331_p12 = pneg %p330_p10  ;;  %p337_p1 = por %p336_p0, %p335_p9 }
  0x20   : > { %p338_p2 = pnand %p337_p1, %p331_p12 }
  0x22   : > { %341 = shalt.err (!%p338_p2)
}
  0x23   : > { %s379_s12 = smov 128   ;;  %s380_s13 = smov 8  }
  0x24   : > { %274 = dma.hbm_to_vmem [thread:$0]  (!%p433_p8), %s440_s22, 384, %s442_s24, %s445_s25, %s379_s12, %s379_s12, %s380_s13  }
  0x25   : > { %p103_p11 = scmp.lt.s32.totalorder %s376_s9, 3  ;;  %p503_p13 = scmp.ge.s32.totalorder %s376_s9, 1 }
  0x27   : > { %p104_p3 = pnand %p503_p13, %p103_p11 }
  0x28   : > { %s109_s16 = sand.u32 (!%p104_p3), 1, %s368_s7  }
  0x29   : > { %107 = sbr.rel (%p104_p3) target bundleno = 582 (0x246), region = 24  ;;  %s110_s18 = scalar_lea.sflag (!%p104_p3), [#allocation3], %s109_s16 }
  0x2a   : > { %s266_s17 = smul.u32 (!%p104_p3), 24, %s109_s16 }
  0x2c   : > { %s113_s20 = scalar_lea.vmem (!%p104_p3), [#allocation2], %s266_s17 }
  0x30   : > { %359 = dma.done.wait (%p427_p7), %s110_s18, 384  }
  0x31   : > { %361 = vsyncadd (%p427_p7), %s110_s18, 4294966912  ;;  %v261_v0 = vld [vmem:[%s113_s20 + $0x10] sm:$0xff]  ;;  %v133_v1 = vld [vmem:[%s113_s20] sm:$0xff]  ;;  %vm182_vm2 = vcmask 7168   ;;  %p130_p7 = scmp.lt.s32.totalorder %s410_s10, 1  ;;  %vm194_vm3 = vcmask 0  }
  0x32   : > { %161 = vadd.xlane.f32.xlu1 %v261_v0  ;;  %134 = vadd.xlane.f32.xlu0 %v133_v1  ;;  %v260_v2 = vld [vmem:[%s113_s20 + $0x8] sm:$0xff] }
  0x33   : > { %s509_s10 = smov (!%p130_p7, %s410_s10), 1 }
  0x34   : > { %s132_s19 = scalar_lea.vmem %s500_s1, %s509_s10 }
  0x36   : > { %147 = vadd.xlane.f32.xlu0 %v260_v2 }
  0xbf   : > { %v162_v3 = vpop.xlane.xlu1 %161  ;;  %v135_v4 = vpop.xlane.xlu0 %134 }
  0xc0   : > { %v163_v5 = vrot.slane %v162_v3, 4  ;;  %v136_v6 = vrot.slane %v135_v4, 4 }
  0xc2   : > { %v164_v7 = vadd.f32 %v163_v5, %v162_v3  ;;  %v137_v8 = vadd.f32 %v136_v6, %v135_v4 }
  0xc3   : > { %v148_v9 = vpop.xlane.xlu0 %147 }
  0xc4   : > { %v165_v10 = vrot.slane %v164_v7, 2  ;;  %v138_v11 = vrot.slane %v137_v8, 2  ;;  %v149_v12 = vrot.slane %v148_v9, 4 }
  0xc6   : > { %v166_v13 = vadd.f32 %v165_v10, %v164_v7  ;;  %v139_v14 = vadd.f32 %v138_v11, %v137_v8  ;;  %v150_v15 = vadd.f32 %v149_v12, %v148_v9 }
  0xc8   : > { %v167_v16 = vrot.slane %v166_v13, 1  ;;  %v140_v17 = vrot.slane %v139_v14, 1  ;;  %v151_v18 = vrot.slane %v150_v15, 2 }
  0xca   : > { %v168_v19 = vadd.f32 %v167_v16, %v166_v13  ;;  %v141_v20 = vadd.f32 %v140_v17, %v139_v14  ;;  %v152_v21 = vadd.f32 %v151_v18, %v150_v15 }
  0xcc   : > { %v142_v22 = vmul.f32 0.0009765625, %v141_v20  ;;  %v153_v23 = vrot.slane %v152_v21, 1  ;;  %v169_v24 = vmul.f32 0.0009765625, %v168_v19 }
  0xce   : > { %v154_v25 = vadd.f32 %v153_v23, %v152_v21  ;;  %v143_v26 = vsub.f32 %v133_v1, %v142_v22  ;;  %v170_v28 = vsub.f32 %v261_v0, %v169_v24 }
  0xd0   : > { %v155_v27 = vmul.f32 0.0009765625, %v154_v25  ;;  %v144_v30 = vmul.f32 %v143_v26, %v143_v26  ;;  %v171_v32 = vmul.f32 %v170_v28, %v170_v28 }
  0xd2   : > { %v156_v29 = vsub.f32 %v260_v2, %v155_v27 }
  0xd4   : > { %v157_v31 = vmul.f32 %v156_v29, %v156_v29 }
  0xd6   : > { %v158_v33 = vadd.f32 %v157_v31, %v144_v30 }
  0xd8   : > { %v172_v34 = vadd.f32 %v171_v32, %v158_v33 }
  0xda   : > { %310 = vrsqrt.f32 %v172_v34  ;;  %vm175_vm0 = vcmp.eq.f32.partialorder %v172_v34, inf  ;;  %v178_v37 = vand.u32 2147483648, %v172_v34  ;;  %vm177_vm1 = vcmp.eq.f32.partialorder %v172_v34, 0.0 }
  0xe4   : > { %v311_v35 = vpop.eup %310 }
  0xe5   : > { %v174_v36 = vmul.f32 %v311_v35, %v172_v34 }
  0xe7   : > { %v176_v38 = vsel %vm175_vm0, %v172_v34, %v174_v36 }
  0xe8   : > { %v179_v39 = vsel %vm177_vm1, %v178_v37, %v176_v38 }
  0xe9   : > { %180 = vadd.xlane.f32.xlu1 %v179_v39 }
 0x176   : > { %v181_v40 = vpop.xlane.xlu1 %180 }
 0x177   : > { %v183_v41 = vsel %vm182_vm2, %v181_v40, 0.0 }
 0x178   : > { %184 = vadd.xlane.f32.xlu0 %v183_v41 }
 0x205   : > { %v185_v42 = vpop.xlane.xlu0 %184 }
 0x206   : > { %v186_v43 = vrot.slane %v185_v42, 4 }
 0x208   : > { %v187_v44 = vadd.f32 %v186_v43, %v185_v42 }
 0x20a   : > { %v188_v45 = vrot.slane %v187_v44, 2 }
 0x20c   : > { %v189_v46 = vadd.f32 %v188_v45, %v187_v44 }
 0x20e   : > { %v190_v47 = vrot.slane %v189_v46, 1 }
 0x210   : > { %v191_v48 = vadd.f32 %v190_v47, %v189_v46 }
 0x212   : > { %267 = vpush %v191_v48 }
 0x243   : > { %s268_s21 = spop %267 }
 0x244   : > { %v193_v49 = vstv %s268_s21 }
 0x245   : > { %195 = vst.msk [vmem:[%s132_s19] sm:$0x1] %vm194_vm3, %v193_v49 }
 0x246 PF: > { %p11_p8 = scmp.ge.s32.totalorder %s413_s11, 4   ;;  %s504_s6 = smov %s368_s7 }
 0x247   : > { %s505_s7 = smov %s372_s8  ;;  %s506_s8 = smov %s423_s14 }
 0x248   : > { %s507_s9 = smov %s413_s11  ;;  %13 = sbr.rel (!%p11_p8) target bundleno = 3 (0x3), region = 66 }
 0x24f   :  { %213 = vsyncpa [#allocation3], 1 }
 0x250   :  { %215 = vsyncpa [#allocation3 + $0x1], 1 }

</bundles_post_ra>
